<compile_context>
chip_gen: v7x
topology: tpu7x:2x2x1
jax: 0.10.0
libtpu: 0.0.40
codegen_flags: <defaults>
</compile_context>

<pallas_src>
import jax
import jax.numpy as jnp
from jax import lax
from jax.experimental import pallas as pl
from jax.experimental.pallas import tpu as pltpu

_SQRT_HALF = 0.7071067811865476


def _gelu_exact(x):
    # Matches torch.nn.GELU() default (erf-based, exact); computed in f32.
    return 0.5 * x * (1.0 + lax.erf(x * _SQRT_HALF))


# ----------------------------- kernels ---------------------------------------

def ffn_resident_kernel(x_ref, w1_ref, b1_ref, w2_ref, b2_ref, o_ref):
    """Weights-resident path: full W1/W2 live in VMEM (constant block index)."""
    h = jnp.dot(x_ref[...], w1_ref[...], preferred_element_type=jnp.float32)
    h = _gelu_exact(h + b1_ref[...].astype(jnp.float32))
    # intermediate_dropout: identity (inference)
    out = jnp.dot(h.astype(w2_ref.dtype), w2_ref[...],
                  preferred_element_type=jnp.float32)
    # output_dropout: identity (inference)
    o_ref[...] = (out + b2_ref[...].astype(jnp.float32)).astype(o_ref.dtype)


def ffn_streaming_kernel(x_ref, w1_ref, b1_ref, w2_ref, b2_ref, o_ref, acc_ref):
    """Streaming path: W1 column slabs / W2 row slabs over a trailing I axis.

    x_ref  : (tm, H)   activation tile (native/matmul dtype)
    w1_ref : (H, tI)   column slab of W1
    b1_ref : (1, tI)
    w2_ref : (tI, H)   row slab of W2
    b2_ref : (1, H)
    o_ref  : (tm, H)   output tile (same block across k)
    acc_ref: (tm, H)   f32 accumulator scratch
    """
    k = pl.program_id(1)

    @pl.when(k == 0)
    def _():
        acc_ref[...] = jnp.zeros_like(acc_ref)

    h = jnp.dot(x_ref[...], w1_ref[...], preferred_element_type=jnp.float32)
    h = _gelu_exact(h + b1_ref[...].astype(jnp.float32))
    # intermediate_dropout: identity (inference)
    acc_ref[...] += jnp.dot(h.astype(w2_ref.dtype), w2_ref[...],
                            preferred_element_type=jnp.float32)

    @pl.when(k == pl.num_programs(1) - 1)
    def _():
        out = acc_ref[...] + b2_ref[...].astype(jnp.float32)
        # output_dropout: identity (inference)
        o_ref[...] = out.astype(o_ref.dtype)


# --------------------------- tiling helpers -----------------------------------

def _round_up(x, m):
    return ((x + m - 1) // m) * m


def _pick_divisor_tile(total, cap, multiple):
    """Largest tile dividing `total`, <= cap, multiple of `multiple`.
    Returns `total` if total <= cap (full extent is always legal); else None if
    no such divisor exists."""
    if total <= cap:
        return total
    t = (min(total, cap) // multiple) * multiple
    while t >= multiple:
        if total % t == 0:
            return t
        t -= multiple
    return None


def _vmem_config(vmem_budget, vmem_limit_bytes):
    """Generation-aware scoped-VMEM limit + explicit tile budget (bytes)."""
    phys = None
    try:
        info = pltpu.get_tpu_info()
        for attr in ("vmem_capacity_bytes", "vmem_size_bytes", "vmem_bytes"):
            v = getattr(info, attr, None)
            if isinstance(v, int) and v > 0:
                phys = v
                break
    except Exception:
        phys = None
    kind = ""
    try:
        kind = jax.devices()[0].device_kind.lower()
    except Exception:
        pass
    if phys is None:
        # v7x: 64 MiB per TensorCore; v5e/v6e: 128 MiB.
        phys = 64 * 1024 * 1024 if "v7" in kind else 128 * 1024 * 1024
    elif "v7" in kind:
        phys = min(phys, 64 * 1024 * 1024)   # never trust a per-chip number on v7x
    if vmem_limit_bytes is None:
        vmem_limit_bytes = min(int(phys * 0.6), 96 * 1024 * 1024)
    if vmem_budget is None:
        # Explicitly accounted tile bytes; leave headroom for compiler temporaries.
        vmem_budget = (vmem_limit_bytes * 3) // 4
    return vmem_budget, vmem_limit_bytes


def _resident_bytes(tm, H, I, x_it, w_it, out_it):
    b = 4 * H * I * w_it                  # W1 + W2 (double-buffered)
    b += 2 * 8 * (I + H) * w_it           # b1 / b2 blocks (sublane-padded, x2 bufs)
    b += 2 * tm * H * x_it                # x tile (double-buffered)
    b += 2 * tm * H * out_it              # out tile (double-buffered)
    b += tm * H * 4                       # f32 output temporary
    b += tm * I * (2 * 4 + w_it)          # (tm, I) f32 intermediates + cast copy
    return b


# ------------------------------ wrapper ---------------------------------------

def prompt_generator_feed_forward(hidden_states, w1, b1, w2, b2, *,
                                  tm=None, ti=None,
                                  matmul_dtype=jnp.bfloat16,
                                  vmem_budget=None, vmem_limit_bytes=None):
    """hidden_states: [B, S, H]; w1: [H, I]; b1: [I]; w2: [I, H]; b2: [H].

    If `matmul_dtype` is set and activations/weights arrive as float32 they are
    cast before the MXU matmuls (accumulation stays f32); set matmul_dtype=None
    for full-f32 matmuls.  Dropouts are identity (inference)."""
    B, S, H = hidden_states.shape
    I = w1.shape[1]
    M = B * S
    out_dtype = hidden_states.dtype

    x2d = hidden_states.reshape(M, H)
    if matmul_dtype is not None:
        if x2d.dtype == jnp.float32:
            x2d = x2d.astype(matmul_dtype)
        if w1.dtype == jnp.float32:
            w1 = w1.astype(matmul_dtype)
        if w2.dtype == jnp.float32:
            w2 = w2.astype(matmul_dtype)

    x_it = jnp.dtype(x2d.dtype).itemsize
    w_it = jnp.dtype(w1.dtype).itemsize
    out_it = jnp.dtype(out_dtype).itemsize

    vmem_budget, vmem_limit_bytes = _vmem_config(vmem_budget, vmem_limit_bytes)

    # ---- row tile ------------------------------------------------------------
    row_mult = 16 if x_it < 4 else 8
    tm_given = tm is not None
    if tm is None:
        tm_cap = 512
        if M >= 2 * row_mult:
            # Keep >= 2 row tiles so both v7x TensorCores get work ("parallel" M axis).
            tm_cap = min(tm_cap, _round_up(pl.cdiv(M, 2), row_mult))
        tm = max(row_mult, min(tm_cap, _round_up(M, row_mult)))
        tm = (tm // row_mult) * row_mult

    # ---- resident vs streaming decision ---------------------------------------
    resident = False
    if ti is None:
        t = tm
        t_min = tm if tm_given else min(tm, 128)
        while True:
            if _resident_bytes(t, H, I, x_it, w_it, out_it) <= vmem_budget:
                resident, tm = True, t
                break
            nt = max(row_mult, ((t // 2) // row_mult) * row_mult)
            if nt >= t or nt < t_min:
                break
            t = nt

    I_pad = I
    if not resident:
        if ti is None:
            # Derive ti from the budget, accounting for the (tm, ti) intermediate.
            while True:
                fixed = (2 * tm * H * x_it        # x tile (double-buffered)
                         + 2 * tm * H * out_it    # out tile (double-buffered)
                         + 2 * tm * H * 4         # f32 acc scratch + f32 temp
                         + 2 * 8 * H * w_it)      # b2 block
                per_ti = 4 * H * w_it + 16 * w_it + tm * (2 * 4 + w_it)
                max_ti = (vmem_budget - fixed) // per_ti
                if max_ti >= 128 or tm_given or tm <= row_mult:
                    break
                tm = max(row_mult, ((tm // 2) // row_mult) * row_mult)
            max_ti = max(int(max_ti), 128)
            # Prefer 256-aligned slabs (v6e/v7x MXU is 256 wide), 128 as fallback.
            ti = _pick_divisor_tile(I, max_ti, 256)
            if ti is None:
                ti = _pick_divisor_tile(I, max_ti, 128)
            if ti is None:
                # No clean divisor: pick an aligned tile and zero-pad I up to it.
                ti = (max_ti // 256) * 256
                if ti < 256:
                    ti = max(128, (max_ti // 128) * 128)
        # Zero-pad I if needed (exact: GELU(0)=0, padded W2 rows contribute 0).
        I_pad = _round_up(I, ti)
        if I_pad != I:
            w1 = jnp.pad(w1, ((0, 0), (0, I_pad - I)))
            b1 = jnp.pad(b1, (0, I_pad - I))
            w2 = jnp.pad(w2, ((0, I_pad - I), (0, 0)))

    # ---- pad rows to a multiple of tm ------------------------------------------
    M_pad = _round_up(M, tm)
    if M_pad != M:
        x2d = jnp.pad(x2d, ((0, M_pad - M), (0, 0)))

    b1_2d = b1.reshape(1, I_pad)
    b2_2d = b2.reshape(1, H)

    # ---- cost estimate ----------------------------------------------------------
    flops = 4 * M * H * I                      # two M x H x I matmuls
    transcendentals = M * I                    # erf per intermediate element
    weight_bytes = ((w1.size + w2.size) * w_it
                    + b1.size * jnp.dtype(b1.dtype).itemsize
                    + b2.size * jnp.dtype(b2.dtype).itemsize)
    weight_stream = weight_bytes if resident else (M_pad // tm) * weight_bytes
    bytes_accessed = M_pad * H * x_it + M_pad * H * out_it + weight_stream
    cost = pl.CostEstimate(flops=flops, transcendentals=transcendentals,
                           bytes_accessed=bytes_accessed)

    if resident:
        out2d = pl.pallas_call(
            ffn_resident_kernel,
            out_shape=jax.ShapeDtypeStruct((M_pad, H), out_dtype),
            grid_spec=pltpu.PrefetchScalarGridSpec(
                num_scalar_prefetch=0,
                grid=(M_pad // tm,),
                in_specs=[
                    pl.BlockSpec((tm, H), lambda i: (i, 0)),     # x tile
                    pl.BlockSpec((H, I_pad), lambda i: (0, 0)),  # W1 (resident)
                    pl.BlockSpec((1, I_pad), lambda i: (0, 0)),  # b1 (resident)
                    pl.BlockSpec((I_pad, H), lambda i: (0, 0)),  # W2 (resident)
                    pl.BlockSpec((1, H), lambda i: (0, 0)),      # b2 (resident)
                ],
                out_specs=pl.BlockSpec((tm, H), lambda i: (i, 0)),
            ),
            compiler_params=pltpu.CompilerParams(
                dimension_semantics=("parallel",),
                vmem_limit_bytes=vmem_limit_bytes),
            cost_estimate=cost,
        )(x2d, w1, b1_2d, w2, b2_2d)
    else:
        out2d = pl.pallas_call(
            ffn_streaming_kernel,
            out_shape=jax.ShapeDtypeStruct((M_pad, H), out_dtype),
            grid_spec=pltpu.PrefetchScalarGridSpec(
                num_scalar_prefetch=0,
                grid=(M_pad // tm, I_pad // ti),                      # reduction last
                in_specs=[
                    pl.BlockSpec((tm, H), lambda i, k: (i, 0)),       # x tile
                    pl.BlockSpec((H, ti), lambda i, k: (0, k)),       # W1 col slab
                    pl.BlockSpec((1, ti), lambda i, k: (0, k)),       # b1 slab
                    pl.BlockSpec((ti, H), lambda i, k: (k, 0)),       # W2 row slab
                    pl.BlockSpec((1, H), lambda i, k: (0, 0)),        # b2
                ],
                out_specs=pl.BlockSpec((tm, H), lambda i, k: (i, 0)), # same block over k
                scratch_shapes=[pltpu.VMEM((tm, H), jnp.float32)],
            ),
            compiler_params=pltpu.CompilerParams(
                dimension_semantics=("parallel", "arbitrary"),
                vmem_limit_bytes=vmem_limit_bytes),
            cost_estimate=cost,
        )(x2d, w1, b1_2d, w2, b2_2d)

    if M_pad != M:
        out2d = out2d[:M]
    return out2d.reshape(B, S, H)


# ------------------------------ reference / init ------------------------------

def init_params(key, hidden_size, intermediate_size, dtype=jnp.float32):
    # Deterministic init mimicking nn.Linear (uniform +/- 1/sqrt(fan_in)).
    k1, k2, k3, k4 = jax.random.split(key, 4)
    lim1 = 1.0 / (hidden_size ** 0.5)
    lim2 = 1.0 / (intermediate_size ** 0.5)
    w1 = jax.random.uniform(k1, (hidden_size, intermediate_size), dtype, -lim1, lim1)
    b1 = jax.random.uniform(k2, (intermediate_size,), dtype, -lim1, lim1)
    w2 = jax.random.uniform(k3, (intermediate_size, hidden_size), dtype, -lim2, lim2)
    b2 = jax.random.uniform(k4, (hidden_size,), dtype, -lim2, lim2)
    return w1, b1, w2, b2


def _reference(hidden_states, w1, b1, w2, b2, matmul_dtype=None):
    B, S, H = hidden_states.shape
    x = hidden_states.reshape(-1, H)
    if matmul_dtype is not None:
        x, w1c, w2c = x.astype(matmul_dtype), w1.astype(matmul_dtype), w2.astype(matmul_dtype)
    else:
        w1c, w2c = w1, w2
    h = jnp.dot(x, w1c, preferred_element_type=jnp.float32) + b1.astype(jnp.float32)
    h = _gelu_exact(h)
    if matmul_dtype is not None:
        h = h.astype(matmul_dtype)
    out = jnp.dot(h, w2c, preferred_element_type=jnp.float32) + b2.astype(jnp.float32)
    return out.reshape(B, S, H).astype(hidden_states.dtype)


if __name__ == "__main__":
    key = jax.random.PRNGKey(0)
    kx, kp, kx2, kp2 = jax.random.split(key, 4)

    # --- Test 1: module-scale shapes, full f32, weights-resident path ------
    B, S, H, I = 2, 8, 32, 64     # batch, seq, hidden_size, intermediate_size
    hidden_states = jax.random.normal(kx, (B, S, H), jnp.float32)
    w1, b1, w2, b2 = init_params(kp, H, I)
    out = jax.block_until_ready(
        prompt_generator_feed_forward(hidden_states, w1, b1, w2, b2, matmul_dtype=None))
    ref = _reference(hidden_states, w1, b1, w2, b2)
    assert out.shape == (B, S, H) and out.dtype == hidden_states.dtype
    assert jnp.allclose(out, ref, atol=1e-4, rtol=1e-4), "mismatch (f32 resident path)"

    # --- Test 2: streaming 2-D grid path (explicit tiles), full f32 --------
    B2, S2, H2, I2 = 2, 64, 128, 256
    hs2 = jax.random.normal(kx2, (B2, S2, H2), jnp.float32)
    p2 = init_params(kp2, H2, I2)
    out2 = jax.block_until_ready(
        prompt_generator_feed_forward(hs2, *p2, tm=64, ti=128, matmul_dtype=None))
    ref2 = _reference(hs2, *p2)
    assert jnp.allclose(out2, ref2, atol=1e-4, rtol=1e-4), "mismatch (streaming path)"

    # --- Test 3: default bf16 matmuls, auto tiling, multi row-tile resident -
    k3a, k3b = jax.random.split(jax.random.PRNGKey(1), 2)
    B3, S3, H3, I3 = 4, 64, 128, 512
    hs3 = jax.random.normal(k3a, (B3, S3, H3), jnp.float32)
    p3 = init_params(k3b, H3, I3)
    out3 = jax.block_until_ready(prompt_generator_feed_forward(hs3, *p3))
    ref3 = _reference(hs3, *p3, matmul_dtype=jnp.bfloat16)
    assert jnp.allclose(out3, ref3, atol=5e-3, rtol=5e-3), "mismatch (bf16 resident path)"

    print("KERNEL_OK")
</pallas_src>

<mosaic_0001>
module attributes {stable_mosaic.version = 11 : i64} {
  func.func @ffn_resident_kernel(%arg0: i32, %arg1: memref<8x32xf32, #tpu.memory_space<vmem>>, %arg2: memref<32x64xf32, #tpu.memory_space<vmem>>, %arg3: memref<1x64xf32, #tpu.memory_space<vmem>>, %arg4: memref<64x32xf32, #tpu.memory_space<vmem>>, %arg5: memref<1x32xf32, #tpu.memory_space<vmem>>, %arg6: memref<8x32xf32, #tpu.memory_space<vmem>>) attributes {dimension_semantics = [#tpu.dimension_semantics<parallel>], iteration_bounds = array<i64: 2>, scalar_prefetch = 0 : i64, scratch_operands = 0 : i64, tpu.core_type = #tpu.core_type<tc>, window_params = [{transform_indices = @transform_0, window_bounds = array<i64: 8, 32>}, {pipeline_mode = #tpu.pipeline_mode<synchronous>, transform_indices = @transform_1, window_bounds = array<i64: 32, 64>}, {pipeline_mode = #tpu.pipeline_mode<synchronous>, transform_indices = @transform_2, window_bounds = array<i64: 1, 64>}, {pipeline_mode = #tpu.pipeline_mode<synchronous>, transform_indices = @transform_3, window_bounds = array<i64: 64, 32>}, {pipeline_mode = #tpu.pipeline_mode<synchronous>, transform_indices = @transform_4, window_bounds = array<i64: 1, 32>}, {transform_indices = @transform_5, window_bounds = array<i64: 8, 32>}]} {
    %c0 = arith.constant 0 : index
    %c0_0 = arith.constant 0 : index
    %0 = vector.load %arg1[%c0, %c0_0] : memref<8x32xf32, #tpu.memory_space<vmem>>, vector<8x32xf32>
    %c0_1 = arith.constant 0 : index
    %c0_2 = arith.constant 0 : index
    %1 = vector.load %arg2[%c0_1, %c0_2] : memref<32x64xf32, #tpu.memory_space<vmem>>, vector<32x64xf32>
    %cst = arith.constant dense<0.000000e+00> : vector<8x64xf32>
    %2 = tpu.matmul %0, %1, %cst {dimension_numbers = #tpu.dot_dimension_numbers<[1], [0], [0], [1], [0, 0, 1, 1], [], []>} : vector<8x32xf32>, vector<32x64xf32>, vector<8x64xf32> -> vector<8x64xf32>
    %c0_3 = arith.constant 0 : index
    %c0_4 = arith.constant 0 : index
    %3 = vector.load %arg3[%c0_3, %c0_4] : memref<1x64xf32, #tpu.memory_space<vmem>>, vector<1x64xf32>
    %4 = vector.broadcast %3 : vector<1x64xf32> to vector<8x64xf32>
    %5 = arith.addf %2, %4 : vector<8x64xf32>
    %cst_5 = arith.constant 5.000000e-01 : f32
    %6 = vector.broadcast %cst_5 : f32 to vector<8x64xf32>
    %7 = arith.mulf %6, %5 : vector<8x64xf32>
    %cst_6 = arith.constant 0.707106769 : f32
    %8 = vector.broadcast %cst_6 : f32 to vector<8x64xf32>
    %9 = arith.mulf %5, %8 : vector<8x64xf32>
    %10 = math.erf %9 : vector<8x64xf32>
    %cst_7 = arith.constant 1.000000e+00 : f32
    %11 = vector.broadcast %cst_7 : f32 to vector<8x64xf32>
    %12 = arith.addf %11, %10 : vector<8x64xf32>
    %13 = arith.mulf %7, %12 : vector<8x64xf32>
    %c0_8 = arith.constant 0 : index
    %c0_9 = arith.constant 0 : index
    %14 = vector.load %arg4[%c0_8, %c0_9] : memref<64x32xf32, #tpu.memory_space<vmem>>, vector<64x32xf32>
    %cst_10 = arith.constant dense<0.000000e+00> : vector<8x32xf32>
    %15 = tpu.matmul %13, %14, %cst_10 {dimension_numbers = #tpu.dot_dimension_numbers<[1], [0], [0], [1], [0, 0, 1, 1], [], []>} : vector<8x64xf32>, vector<64x32xf32>, vector<8x32xf32> -> vector<8x32xf32>
    %c0_11 = arith.constant 0 : index
    %c0_12 = arith.constant 0 : index
    %16 = vector.load %arg5[%c0_11, %c0_12] : memref<1x32xf32, #tpu.memory_space<vmem>>, vector<1x32xf32>
    %17 = vector.broadcast %16 : vector<1x32xf32> to vector<8x32xf32>
    %18 = arith.addf %15, %17 : vector<8x32xf32>
    %c0_13 = arith.constant 0 : index
    %c0_14 = arith.constant 0 : index
    %19 = vector.load %arg6[%c0_13, %c0_14] : memref<8x32xf32, #tpu.memory_space<vmem>>, vector<8x32xf32>
    tpu.vector_store %arg6[%c0_13, %c0_14], %18 {strides = array<i32>} : memref<8x32xf32, #tpu.memory_space<vmem>>, vector<8x32xf32>,
    return
  }
  func.func @transform_0(%arg0: i32) -> (i32, i32) {
    %c0_i32 = arith.constant 0 : i32
    %c0_i32_0 = arith.constant 0 : i32
    return %arg0, %c0_i32 : i32, i32
  }
  func.func @transform_1(%arg0: i32) -> (i32, i32) {
    %c0_i32 = arith.constant 0 : i32
    %c0_i32_0 = arith.constant 0 : i32
    %c0_i32_1 = arith.constant 0 : i32
    return %c0_i32, %c0_i32_0 : i32, i32
  }
  func.func @transform_2(%arg0: i32) -> (i32, i32) {
    %c0_i32 = arith.constant 0 : i32
    %c0_i32_0 = arith.constant 0 : i32
    %c0_i32_1 = arith.constant 0 : i32
    return %c0_i32, %c0_i32_0 : i32, i32
  }
  func.func @transform_3(%arg0: i32) -> (i32, i32) {
    %c0_i32 = arith.constant 0 : i32
    %c0_i32_0 = arith.constant 0 : i32
    %c0_i32_1 = arith.constant 0 : i32
    return %c0_i32, %c0_i32_0 : i32, i32
  }
  func.func @transform_4(%arg0: i32) -> (i32, i32) {
    %c0_i32 = arith.constant 0 : i32
    %c0_i32_0 = arith.constant 0 : i32
    %c0_i32_1 = arith.constant 0 : i32
    return %c0_i32, %c0_i32_0 : i32, i32
  }
  func.func @transform_5(%arg0: i32) -> (i32, i32) {
    %c0_i32 = arith.constant 0 : i32
    %c0_i32_0 = arith.constant 0 : i32
    return %arg0, %c0_i32 : i32, i32
  }
}

</mosaic_0001>

<bundles_post_ra>
// kernel: tpu_custom_call.1
= control target key start
LH: loop header
LB: loop body
LE: loop exit
PB: predicated region body
PF: predicated region fallthrough
CT: control target
= control target key end

     0   :  { %10 = vsyncpa [#allocation3], 0  ;;  %s1323_s0 = inlined_call_operand.hbm [shape: f32[16,32], index: 0, kind: input, shape index: {}]   ;;  %s1324_s1 = inlined_call_operand.hbm [shape: f32[32,64], index: 1, kind: input, shape index: {}]   ;;  %s1325_s2 = inlined_call_operand.hbm [shape: f32[1,64], index: 2, kind: input, shape index: {}]   ;;  %s1326_s3 = inlined_call_operand.hbm [shape: f32[64,32], index: 3, kind: input, shape index: {}]   ;;  %s1327_s4 = inlined_call_operand.hbm [shape: f32[1,32], index: 4, kind: input, shape index: {}]   ;;  %s1328_s5 = inlined_call_operand.hbm [shape: f32[16,32], index: 5, kind: output, shape index: {}]  }
   0x1   :  { %12 = vsyncpa [#allocation3 + $0x1], 0 }
   0x2   :  { %13 = vsyncpa [#allocation6], 0 }
   0x3   :  { %14 = vsyncpa [#allocation9], 0 }
   0x4   :  { %15 = vsyncpa [#allocation4], 0 }
   0x5   :  { %17 = vsyncpa [#allocation4 + $0x1], 0  ;;  %s1036_s18 = smov 0   ;;  %s1038_s19 = smov 0  }
   0x6   :  { %s1040_s20 = smov 0   ;;  %s1042_s21 = smov 0  }
   0x7 LB: > { %s995_s22 = smov [#allocation5]   ;;  %s1057_s24 = sadd.s32 4294967295, %s993_s21   ;;  %s993_s21 = sphi %s1042_s21, %s1352_s21   ;;  %s989_s20 = sphi %s1040_s20, %s1351_s20   ;;  %s985_s19 = sphi %s1038_s19, %s1350_s19   ;;  %s981_s18 = sphi %s1036_s18, %s1349_s18  }
   0x8   : > { %s176_s23 = sshll.u32 %s995_s22, 4  ;;  %p598_p0 = scmp.ge.s32.totalorder %s993_s21, 1  ;;  %s1062_s23 = int_to_ptr.vmem [resolvable:$true] %s176_s23 }
   0x9   : > { %p1329_p1 = scmp.eq.s32.totalorder %s1057_s24, 0  ;;  %p164_p2 = scmp.lt.s32.totalorder %s993_s21, 3 }
   0xa   : > { %s996_s26 = smov [#allocation8]   ;;  %s997_s29 = smov [#allocation7]  }
   0xb   : > { %p1064_p3 = pnand %p598_p0, %p164_p2  ;;  %s200_s27 = sshll.u32 %s996_s26, 4  ;;  %s1077_s27 = int_to_ptr.vmem [resolvable:$true] %s200_s27 }
   0xc   : > { %s190_s30 = sshll.u32 %s997_s29, 4  ;;  %s777_s8 = scalar_lea.hbm %s1324_s1, 512  ;;  %s1079_s30 = int_to_ptr.vmem [resolvable:$true] %s190_s30 }
   0xd   : > { %s1332_s25 = scalar_select %p1064_p3, 1, 0 }
   0xe   : > { %p703_p5 = pneg %p1064_p3  ;;  %p778_p7 = scmp.ne.s32.totalorder %s1324_s1, %s777_s8 }
   0xf   : > { %p784_p11 = scmp.lt.u32.totalorder %s777_s8, %s1324_s1 }
  0x10   : > { %p1073_p6 = pnand %p703_p5, %p1329_p1 }
  0x12   : > { %p1089_p8 = pneg %p1073_p6 }
  0x14   : > { %p780_p9 = pnand %p1089_p8, %p778_p7 }
  0x16   : > { %p781_p10 = pneg %p780_p9 }
  0x18   : > { %p786_p12 = pnand %p784_p11, %p781_p10 }
  0x1a   : > { %789 = shalt.err (!%p786_p12)
}
  0x1b   : > { %s790_s14 = scalar_lea.vmem %s1062_s23, 512  ;;  %p798_p5 = scmp.lt.s32.totalorder %s1062_s23, %s1062_s23 }
  0x1c   : > { %p791_p13 = scmp.ne.s32.totalorder %s1062_s23, %s790_s14  ;;  %p799_p4 = scmp.lt.s32.totalorder %s790_s14, %s790_s14 }
  0x1e   : > { %p793_p0 = pnand %p791_p13, %p1089_p8  ;;  %p800_p7 = por %p799_p4, %p798_p5 }
  0x20   : > { %p794_p2 = pneg %p793_p0 }
  0x22   : > { %p801_p9 = pnand %p800_p7, %p794_p2 }
  0x24   : > { %804 = shalt.err (!%p801_p9)
}
  0x25   : > { %s998_s15 = smov 128   ;;  %s999_s16 = smov 8  }
  0x26   : > { %706 = dma.hbm_to_vmem [thread:$0]  (!%p1073_p6), %s1324_s1, 512, %s1062_s23, [#allocation6], %s998_s15, %s998_s15, %s999_s16  }
  0x27   : > { %s805_s6 = scalar_lea.hbm %s1326_s3, 1024 }
  0x28   : > { %p806_p4 = scmp.ne.s32.totalorder %s1326_s3, %s805_s6  ;;  %p812_p12 = scmp.lt.u32.totalorder %s805_s6, %s1326_s3 }
  0x2a   : > { %p808_p10 = pnand %p806_p4, %p1089_p8 }
  0x2c   : > { %p809_p11 = pneg %p808_p10 }
  0x2e   : > { %p814_p13 = pnand %p812_p12, %p809_p11 }
  0x30   : > { %817 = shalt.err (!%p814_p13)
}
  0x31   : > { %s818_s23 = scalar_lea.vmem %s1077_s27, 1024  ;;  %p826_p7 = scmp.lt.s32.totalorder %s1077_s27, %s1077_s27 }
  0x32   : > { %p819_p0 = scmp.ne.s32.totalorder %s1077_s27, %s818_s23  ;;  %p827_p9 = scmp.lt.s32.totalorder %s818_s23, %s818_s23 }
  0x34   : > { %p821_p2 = pnand %p819_p0, %p1089_p8  ;;  %p828_p4 = por %p827_p9, %p826_p7 }
  0x36   : > { %p822_p5 = pneg %p821_p2 }
  0x38   : > { %p829_p10 = pnand %p828_p4, %p822_p5 }
  0x3a   : > { %832 = shalt.err (!%p829_p10)
}
  0x3b   : > { %712 = dma.hbm_to_vmem [thread:$0]  (!%p1073_p6), %s1326_s3, 1024, %s1077_s27, [#allocation9], %s998_s15, %s998_s15, %s999_s16  }
  0x3c   : > { %s833_s22 = scalar_lea.hbm %s1325_s2, 16 }
  0x3d   : > { %p834_p11 = scmp.ne.s32.totalorder %s1325_s2, %s833_s22  ;;  %p840_p0 = scmp.lt.u32.totalorder %s833_s22, %s1325_s2 }
  0x3f   : > { %p836_p12 = pnand %p834_p11, %p1089_p8 }
  0x41   : > { %p837_p13 = pneg %p836_p12 }
  0x43   : > { %p842_p2 = pnand %p840_p0, %p837_p13 }
  0x45   : > { %845 = shalt.err (!%p842_p2)
}
  0x46   : > { %s846_s27 = scalar_lea.vmem %s1079_s30, 16  ;;  %s853_s15 = scalar_lea.vmem %s1079_s30, 32 }
  0x47   : > { %p847_p5 = scmp.ne.s32.totalorder %s1079_s30, %s846_s27  ;;  %p854_p4 = scmp.lt.s32.totalorder %s1079_s30, %s1079_s30 }
  0x48   : > { %p855_p10 = scmp.lt.s32.totalorder %s853_s15, %s846_s27 }
  0x49   : > { %p849_p7 = pnand %p847_p5, %p1089_p8 }
  0x4a   : > { %p856_p11 = por %p855_p10, %p854_p4 }
  0x4b   : > { %p850_p9 = pneg %p849_p7 }
  0x4d   : > { %p857_p12 = pnand %p856_p11, %p850_p9 }
  0x4f   : > { %860 = shalt.err (!%p857_p12)
}
  0x50   : > { %709 = dma.hbm_to_vmem [thread:$0]  (!%p1073_p6), %s1325_s2, 16, %s1079_s30, [#allocation6]  }
  0x51   : > { %s1000_s9 = smov [#allocation10]   ;;  %s861_s13 = scalar_lea.hbm %s1327_s4, 16 }
  0x52   : > { %s214_s10 = sshll.u32 %s1000_s9, 4  ;;  %p862_p13 = scmp.ne.s32.totalorder %s1327_s4, %s861_s13  ;;  %s215_s10 = int_to_ptr.vmem [resolvable:$true] %s214_s10 }
  0x53   : > { %p868_p5 = scmp.lt.u32.totalorder %s861_s13, %s1327_s4 }
  0x54   : > { %p864_p0 = pnand %p862_p13, %p1089_p8 }
  0x56   : > { %p865_p2 = pneg %p864_p0 }
  0x58   : > { %p870_p7 = pnand %p868_p5, %p865_p2 }
  0x5a   : > { %873 = shalt.err (!%p870_p7)
}
  0x5b   : > { %s874_s30 = scalar_lea.vmem %s215_s10, 16  ;;  %s881_s29 = scalar_lea.vmem %s215_s10, 32 }
  0x5c   : > { %p875_p9 = scmp.ne.s32.totalorder %s215_s10, %s874_s30  ;;  %p882_p11 = scmp.lt.s32.totalorder %s215_s10, %s215_s10 }
  0x5d   : > { %p883_p12 = scmp.lt.s32.totalorder %s881_s29, %s874_s30 }
  0x5e   : > { %p877_p4 = pnand %p875_p9, %p1089_p8 }
  0x5f   : > { %p884_p1 = por %p883_p12, %p882_p11 }
  0x60   : > { %p878_p10 = pneg %p877_p4 }
  0x62   : > { %p885_p3 = pnand %p884_p1, %p878_p10 }
  0x64   : > { %888 = shalt.err (!%p885_p3)
}
  0x65   : > { %715 = dma.hbm_to_vmem [thread:$0]  (!%p1073_p6), %s1327_s4, 16, %s215_s10, [#allocation9]  }
  0x66   : > { %s597_s11 = sadd.s32 4294967294, %s993_s21   ;;  %s1177_s28 = sadd.s32 1, %s993_s21  }
  0x67   : > { %s27_s27 = ssub.s32 %s993_s21, %s1177_s28  ;;  %s30_s15 = sadd.s32 1, %s989_s20 }
  0x68   : > { %p28_p1 = scmp.eq.s32.totalorder %s27_s27, 0  ;;  %p37_p3 = scmp.ne.s32.totalorder %s989_s20, %s985_s19 }
  0x69   : > { %p38_p8 = scmp.eq.s32.totalorder %s993_s21, 0  ;;  %p43_p13 = scmp.ne.s32.totalorder %s985_s19, %s981_s18 }
  0x6a   : > { %s1188_s16 = scalar_select %p28_p1, %s989_s20, %s30_s15  }
  0x6b   : > { %p1190_p0 = por %p38_p8, %p37_p3  ;;  %p1336_p2 = scmp.eq.s32.totalorder %s1057_s24, 0 }
  0x6c   : > { %p151_p5 = scmp.eq.s32.totalorder %s1057_s24, 1  ;;  %p157_p7 = scmp.eq.s32.totalorder %s597_s11, 1 }
  0x6d   : > { %p1196_p6 = por %p1336_p2, %p43_p13  ;;  %p728_p9 = scmp.lt.s32.totalorder %s993_s21, 2 }
  0x6e   : > { %s225_s10 = sand.u32 1, %s989_s20   ;;  %p1203_p4 = por %p151_p5, %p37_p3 }
  0x6f   : > { %p1207_p10 = por %p157_p7, %p43_p13  ;;  %s604_s13 = sshll.u32 %s225_s10, 3 }
  0x70   : > { %s1338_s23 = scalar_select %p1203_p4, 1, 0 }
  0x71   : > { %s1339_s12 = scalar_select %p1207_p10, 1, 0 }
  0x72   : > { %s605_s14 = sshll.u32 %s993_s21, 7  ;;  %s229_s30 = scalar_lea.vmem [#allocation2], %s604_s13 }
  0x73   : > { %s1215_s26 = scalar_lea.hbm %s1323_s0, %s605_s14  ;;  %s236_s29 = sshll.u32 %s229_s30, 4  ;;  %s1217_s29 = int_to_ptr.vmem [resolvable:$true] %s236_s29 }
  0x74   : > { %p1221_p11 = pnand %p728_p9, %p1190_p0  ;;  %s226_s7 = scalar_lea.sflag [#allocation3], %s225_s10 }
  0x75   : > { %s889_s11 = scalar_lea.hbm %s1215_s26, 128  ;;  %s894_s13 = scalar_lea.hbm %s1323_s0, 256 }
  0x76   : > { %p890_p12 = scmp.ne.s32.totalorder %s1215_s26, %s889_s11  ;;  %p891_p1 = pneg %p1221_p11 }
  0x77   : > { %p895_p13 = scmp.lt.u32.totalorder %s1215_s26, %s1323_s0  ;;  %p896_p0 = scmp.lt.u32.totalorder %s894_s13, %s889_s11 }
  0x78   : > { %p892_p3 = pnand %p891_p1, %p890_p12  ;;  %p898_p5 = scmp.lt.u32.totalorder %s889_s11, %s1215_s26 }
  0x79   : > { %p897_p2 = por %p896_p0, %p895_p13 }
  0x7a   : > { %p893_p8 = pneg %p892_p3 }
  0x7b   : > { %p899_p7 = por %p898_p5, %p897_p2 }
  0x7d   : > { %p900_p9 = pnand %p899_p7, %p893_p8 }
  0x7f   : > { %903 = shalt.err (!%p900_p9)
}
  0x80   : > { %s904_s10 = scalar_lea.vmem %s1217_s29, 128  ;;  %s1001_s17 = smov [#allocation2]  }
  0x81   : > { %p905_p12 = scmp.ne.s32.totalorder %s1217_s29, %s904_s10  ;;  %s909_s22 = sshll.u32 %s1001_s17, 4  ;;  %s910_s22 = int_to_ptr.vmem [resolvable:$false] %s909_s22 }
  0x82   : > { %s911_s30 = scalar_lea.vmem %s910_s22, 256  ;;  %p912_p4 = scmp.lt.s32.totalorder %s1217_s29, %s910_s22 }
  0x83   : > { %p907_p3 = pnand %p905_p12, %p891_p1  ;;  %p913_p13 = scmp.lt.s32.totalorder %s911_s30, %s904_s10 }
  0x85   : > { %p908_p10 = pneg %p907_p3  ;;  %p914_p0 = por %p913_p13, %p912_p4 }
  0x87   : > { %p915_p2 = pnand %p914_p0, %p908_p10 }
  0x89   : > { %918 = shalt.err (!%p915_p2)
}
  0x8a   : > { %719 = dma.hbm_to_vmem [thread:$0]  (!%p1221_p11), %s1215_s26, 128, %s1217_s29, %s226_s7  }
  0x8b   : > { %p1341_p8 = scmp.ne.s32.totalorder %s1332_s25, 0 }
  0x8c   : > { %s1253_s11 = sand.u32 (!%p1341_p8), 1, %s985_s19  }
  0x8d   : > { %245 = sbr.rel (%p1341_p8) target bundleno = 624 (0x270), region = 40  ;;  %s607_s27 = sshll.u32 (!%p1341_p8), %s1253_s11, 3 }
  0x8e   : > { %s248_s15 = scalar_lea.sflag (!%p1341_p8), [#allocation3], %s1253_s11  ;;  %s251_s13 = scalar_lea.vmem (!%p1341_p8), [#allocation2], %s607_s27 }
  0x94   : > { %964 = dma.done.wait (%p1196_p6), %s248_s15, 128  }
  0x95   : > { %966 = vsyncadd (%p1196_p6), %s248_s15, 4294967168  ;;  %p1342_p4 = scmp.eq.s32.totalorder %s1057_s24, 0 }
  0x97   : > { %968 = dma.done.wait (%p1342_p4), [#allocation6], 528   ;;  %p1343_p10 = pmov %p1342_p4 }
  0x98   : > { %p1344_p11 = pmov %p1342_p4 }
  0x99   : > { %970 = vsyncadd (%p1343_p10), [#allocation6], 4294966768 }
  0x9a   : > { %972 = dma.done.wait (%p1344_p11), [#allocation9], 1040   ;;  %p1345_p1 = pmov %p1342_p4 }
  0x9b   : > { %v1002_v0 = vmov 0.0|0.0   ;;  %vm1003_vm0 = vmmov 0   ;;  %v1004_v1 = vmov 0.0   ;;  %v295_v2 = vld [vmem:[#allocation5] sm:$0xff]  ;;  %v296_v3 = vld [vmem:[#allocation5 + $0x8] sm:$0xff]  ;;  %v297_v4 = vld [vmem:[#allocation5 + $0x10] sm:$0xff] }
  0x9c   : > { %974 = vsyncadd (%p1345_p1), [#allocation9], 4294966256  ;;  %665 = vmatprep.subr.bf16.mxu0 %v1002_v0  ;;  %643 = vmatprep.mubr.msk.f32.mxu0 %vm1003_vm0, %v1004_v1  ;;  %v666_v5 = vpack.c.bf16 %v296_v3, %v295_v2  ;;  %v298_v6 = vld [vmem:[#allocation5 + $0x18] sm:$0xff]  ;;  %vm306_vm1 = vcmask 261120   ;;  %v385_v9 = vld [vmem:[#allocation8] sm:$0xff]  ;;  %vm400_vm2 = vcmask 523264  }
  0x9d   : > { %671 = vmatprep.subr.bf16.mxu1 %v1002_v0  ;;  %662 = vmatprep.mubr.msk.f32.mxu1 %vm1003_vm0, %v1004_v1  ;;  %v669_v7 = vpack.c.bf16 %v298_v6, %v297_v4  ;;  %v294_v8 = vld [vmem:[%s251_s13] sm:$0xff]  ;;  %v389_v15 = vld [vmem:[#allocation8 + $0x20] sm:$0xff]  ;;  %v613_v21 = vld [vmem:[#allocation7] ss:$0 sm:$0xff]  ;;  %s618_s25 = sshll.u32 %s1057_s24, 7  ;;  %s293_s9 = scalar_lea.vmem [#allocation11], %s607_s27 }
  0x9e   : > { %667 = vmatpush3.bf16.msra.mxu0 %v666_v5  ;;  %v386_v10 = vld [vmem:[#allocation8 + $0x8] sm:$0xff]  ;;  %v387_v12 = vld [vmem:[#allocation8 + $0x10] sm:$0xff]  ;;  %v388_v13 = vld [vmem:[#allocation8 + $0x18] sm:$0xff]  ;;  %s489_s26 = sshll.u32 %s293_s9, 4  ;;  %s1278_s7 = scalar_lea.hbm %s1328_s5, %s618_s25  ;;  %s1280_s26 = int_to_ptr.vmem [resolvable:$true] %s489_s26 }
  0x9f   : > { %668 = vmatprep.subr.bf16.mxu0 %v1002_v0  ;;  %v672_v11 = vpack.c.bf16 %v386_v10, %v385_v9  ;;  %v675_v14 = vpack.c.bf16 %v388_v13, %v387_v12  ;;  %v390_v16 = vld [vmem:[#allocation8 + $0x28] sm:$0xff]  ;;  %v391_v18 = vld [vmem:[#allocation8 + $0x30] sm:$0xff]  ;;  %v392_v19 = vld [vmem:[#allocation8 + $0x38] sm:$0xff]  ;;  %s476_s8 = scalar_lea.sflag [#allocation4], %s1253_s11  ;;  %s919_s24 = scalar_lea.vmem %s1280_s26, 128 }
  0xa0   : > { %v678_v17 = vpack.c.bf16 %v390_v16, %v389_v15  ;;  %v681_v20 = vpack.c.bf16 %v392_v19, %v391_v18  ;;  %v615_v30 = vld [vmem:[#allocation10] ss:$0 sm:$0xff]  ;;  %p920_p6 = scmp.ne.s32.totalorder %s1280_s26, %s919_s24  ;;  %p1346_p5 = scmp.ne.s32.totalorder %s1338_s23, 0 }
  0xa1   : > { %673 = vmatpush3.bf16.msra.mxu1 %v672_v11  ;;  %s1005_s14 = smov [#allocation11]  }
  0xa2   : > { %670 = vmatpush3.bf16.msra.mxu0 %v669_v7  ;;  %674 = vmatprep.subr.bf16.mxu1 %v1002_v0  ;;  %p921_p7 = pnand %p920_p6, %p1346_p5  ;;  %s923_s10 = sshll.u32 %s1005_s14, 4  ;;  %s924_s10 = int_to_ptr.vmem [resolvable:$false] %s923_s10 }
  0xa3   : > { %s925_s17 = scalar_lea.vmem %s924_s10, 256  ;;  %p926_p12 = scmp.lt.s32.totalorder %s1280_s26, %s924_s10 }
  0xa4   : > { %p922_p9 = pneg %p921_p7  ;;  %p927_p3 = scmp.lt.s32.totalorder %s925_s17, %s919_s24 }
  0xa5   : > { %644 = vmatmul.mubr.msk.f32.vlgmr.msra.gmra.mrb[0].mxu0 %vm306_vm1, %v294_v8  ;;  %676 = vmatpush3.bf16.msra.mxu1 %v675_v14 }
  0xa6   : > { %677 = vmatprep.subr.bf16.mxu1 %v1002_v0  ;;  %p928_p13 = por %p927_p3, %p926_p12 }
  0xa8   : > { %p929_p0 = pnand %p928_p13, %p922_p9 }
  0xa9   : > { %679 = vmatpush3.bf16.msra.mxu1 %v678_v17 }
  0xaa   : > { %680 = vmatprep.subr.bf16.mxu1 %v1002_v0 }
  0xad   : > { %682 = vmatpush3.bf16.msra.mxu1 %v681_v20 }
 0x178   : > { %v376_v22 = vpop.f32.mrb[0].mxu0 }
 0x179   : > { %v377_v23 = vadd.f32 %v613_v21, %v376_v22  ;;  %v645_v24 = vpop.f32.mrb[1].mxu0 }
 0x17b   : > { %v381_v25 = vmul.f32 0.70710677, %v377_v23  ;;  %v380_v27 = vmul.f32 0.5, %v377_v23 }
 0x17d   : > { %775 = verf.f32 %v381_v25 }
 0x187   : > { %v776_v26 = vpop.eup %775 }
 0x188   : > { %v383_v28 = vadd.f32 1.0, %v776_v26 }
 0x18a   : > { %v384_v29 = vmul.f32 %v383_v28, %v380_v27 }
 0x18c   : > { %663 = vmatmul.mubr.msk.f32.vlgmr.msra.gmra.mrb[0].mxu1 %vm400_vm2, %v384_v29 }
 0x25f   : > { %v470_v31 = vpop.f32.mrb[0].mxu1 }
 0x260   : > { %v471_v32 = vadd.f32 %v615_v30, %v470_v31  ;;  %v664_v33 = vpop.f32.mrb[1].mxu1 }
 0x262   : > { %474 = vst.msk [vmem:[%s293_s9] sm:$0xff] %vm306_vm1, %v471_v32 }
 0x263   : > { %932 = shalt.err (!%p929_p0)
}
 0x264   : > { %s933_s22 = scalar_lea.hbm %s1278_s7, 128  ;;  %s937_s27 = scalar_lea.hbm %s1328_s5, 256 }
 0x265   : > { %p934_p2 = scmp.ne.s32.totalorder %s1278_s7, %s933_s22  ;;  %p938_p10 = scmp.lt.u32.totalorder %s1278_s7, %s1328_s5 }
 0x266   : > { %p939_p11 = scmp.lt.u32.totalorder %s937_s27, %s933_s22  ;;  %p941_p6 = scmp.lt.u32.totalorder %s933_s22, %s1278_s7 }
 0x267   : > { %p935_p8 = pnand %p934_p2, %p1346_p5 }
 0x268   : > { %p940_p1 = por %p939_p11, %p938_p10 }
 0x269   : > { %p936_p4 = pneg %p935_p8 }
 0x26a   : > { %p942_p7 = por %p941_p6, %p940_p1 }
 0x26c   : > { %p943_p9 = pnand %p942_p7, %p936_p4 }
 0x26e   : > { %946 = shalt.err (!%p943_p9)
}
 0x26f   : > { %701 = dma.vmem_to_hbm [thread:$0]  (%p1346_p5), %s1280_s26, 128, %s1278_s7, %s476_s8  }
 0x270 PF: > { %s501_s25 = sand.u32 1, %s981_s18   ;;  %p1347_p12 = scmp.ne.s32.totalorder %s1339_s12, 0 }
 0x271   : > { %p1348_p3 = scmp.ge.s32.totalorder %s993_s21, 2  ;;  %s502_s9 = scalar_lea.sflag [#allocation4], %s501_s25 }
 0x273   : > { %p721_p13 = pnand %p1348_p3, %p1347_p12 }
 0x275   : > { %976 = dma.done.wait (!%p721_p13), %s502_s9, 128  }
 0x276   : > { %978 = vsyncadd (!%p721_p13), %s502_s9, 4294967168  ;;  %p20_p0 = scmp.ge.s32.totalorder %s1177_s28, 4   ;;  %s1349_s18 = smov %s985_s19 }
 0x277   : > { %s1350_s19 = smov %s989_s20  ;;  %s1351_s20 = smov %s1188_s16 }
 0x278   : > { %s1352_s21 = smov %s1177_s28  ;;  %22 = sbr.rel (!%p20_p0) target bundleno = 7 (0x7), region = 101 }
 0x27f   :  { %507 = vsyncpa [#allocation3], 1 }
 0x280   :  { %509 = vsyncpa [#allocation3 + $0x1], 1 }
 0x281   :  { %510 = vsyncpa [#allocation6], 1 }
 0x282   :  { %511 = vsyncpa [#allocation9], 1 }
 0x283   :  { %512 = vsyncpa [#allocation4], 1 }
 0x284   :  { %514 = vsyncpa [#allocation4 + $0x1], 1 }

</bundles_post_ra>
